<compile_context>
chip_gen: v7x
topology: tpu7x:2x2x1
jax: 0.10.0
libtpu: 0.0.40
codegen_flags: <defaults>
</compile_context>

<pallas_src>
import functools

import jax
import jax.numpy as jnp
from jax.experimental import pallas as pl
from jax.experimental.pallas import tpu as pltpu


def _round_up(n, m):
    return ((n + m - 1) // m) * m


def _pad2(a, shape, value=0.0):
    return jnp.pad(
        a,
        ((0, shape[0] - a.shape[0]), (0, shape[1] - a.shape[1])),
        constant_values=value,
    )


def _leaky_rnn_kernel(x_ref, spike_ref, prob_state_ref, u_ref,
                      wih_ref, whh_ref, whh_t_ref,
                      prob_out, spike_out, pred_out,
                      *, alpha, unimix):
    x = x_ref[...]
    spike_prev = spike_ref[...]
    prob_prev = prob_state_ref[...]

    # bf16 operands on the MXU, f32 accumulation.
    input_term = jnp.dot(x.astype(jnp.bfloat16), wih_ref[...],
                         preferred_element_type=jnp.float32)
    hidden_term = jnp.dot(spike_prev.astype(jnp.bfloat16), whh_ref[...],
                          preferred_element_type=jnp.float32)

    # Element-wise math in f32 (EUP sigmoid).
    pre = alpha * prob_prev + (1.0 - alpha) * (input_term + hidden_term)
    prob = jax.nn.sigmoid(pre)
    prob = (1.0 - unimix) * prob + unimix * 0.5

    # pred = sigmoid(prob @ W_hh.T); W_hh.T precomputed host-side (no vxpose).
    pred = jax.nn.sigmoid(jnp.dot(prob.astype(jnp.bfloat16), whh_t_ref[...],
                                  preferred_element_type=jnp.float32))

    # Bernoulli(prob) sample.  Straight-through term (prob - prob.detach())
    # is identically zero in the forward value.
    spike = (u_ref[...] < prob).astype(jnp.float32)

    prob_out[...] = prob
    spike_out[...] = spike
    pred_out[...] = pred


def leaky_rnn_cell_forward(x, state, w_ih, w_hh, *, alpha, unimix=0.01,
                           key=None, batch_tile=128):
    B, input_size = x.shape
    hidden = w_hh.shape[0]
    assert w_ih.shape == (input_size, hidden)
    assert state["prob"].shape == (B, hidden)
    assert state["spike"].shape == (B, hidden)

    if key is None:
        key = jax.random.PRNGKey(0)

    # Pad to MXU/vreg-friendly shapes: lanes -> 128, sublanes -> 8.
    tb = min(batch_tile, _round_up(B, 8))
    b_pad = _round_up(B, tb)
    in_pad = _round_up(input_size, 128)
    h_pad = _round_up(hidden, 128)

    x_p = _pad2(x.astype(jnp.float32), (b_pad, in_pad))
    spike_p = _pad2(state["spike"].astype(jnp.float32), (b_pad, h_pad))
    prob_p = _pad2(state["prob"].astype(jnp.float32), (b_pad, h_pad))

    # bf16 weights: halve HBM/VMEM traffic and run the MXU at bf16 throughput.
    wih_p = _pad2(w_ih, (in_pad, h_pad)).astype(jnp.bfloat16)
    whh_p = _pad2(w_hh, (h_pad, h_pad)).astype(jnp.bfloat16)
    whh_t_p = _pad2(w_hh.T, (h_pad, h_pad)).astype(jnp.bfloat16)

    # Uniform [0,1) draws for the Bernoulli sample (pad with 1.0 so padded
    # lanes produce spike=0; they are sliced away anyway).
    u = jax.random.uniform(key, (B, hidden), dtype=jnp.float32)
    u_p = _pad2(u, (b_pad, h_pad), value=1.0)

    kernel = functools.partial(_leaky_rnn_kernel,
                               alpha=float(alpha), unimix=float(unimix))

    out_shapes = (
        jax.ShapeDtypeStruct((b_pad, h_pad), jnp.float32),  # prob
        jax.ShapeDtypeStruct((b_pad, h_pad), jnp.float32),  # spike
        jax.ShapeDtypeStruct((b_pad, h_pad), jnp.float32),  # pred
    )

    grid = (b_pad // tb,)
    grid_spec = pltpu.PrefetchScalarGridSpec(
        num_scalar_prefetch=0,
        grid=grid,
        in_specs=[
            pl.BlockSpec((tb, in_pad), lambda i: (i, 0)),        # x
            pl.BlockSpec((tb, h_pad), lambda i: (i, 0)),         # spike state
            pl.BlockSpec((tb, h_pad), lambda i: (i, 0)),         # prob state
            pl.BlockSpec((tb, h_pad), lambda i: (i, 0)),         # uniforms
            pl.BlockSpec((in_pad, h_pad), lambda i: (0, 0)),     # W_ih (resident)
            pl.BlockSpec((h_pad, h_pad), lambda i: (0, 0)),      # W_hh (resident)
            pl.BlockSpec((h_pad, h_pad), lambda i: (0, 0)),      # W_hh.T (resident)
        ],
        out_specs=[
            pl.BlockSpec((tb, h_pad), lambda i: (i, 0)),
            pl.BlockSpec((tb, h_pad), lambda i: (i, 0)),
            pl.BlockSpec((tb, h_pad), lambda i: (i, 0)),
        ],
    )

    prob_o, spike_o, pred_o = pl.pallas_call(
        kernel,
        out_shape=out_shapes,
        grid_spec=grid_spec,
        compiler_params=pltpu.CompilerParams(
            dimension_semantics=("parallel",),   # batch tiles -> both TCs on v7x
            vmem_limit_bytes=64 * 1024 * 1024,   # safe on v7x's 64 MiB VMEM
        ),
    )(x_p, spike_p, prob_p, u_p, wih_p, whh_p, whh_t_p)

    prob = prob_o[:B, :hidden]
    spike = spike_o[:B, :hidden]
    pred = pred_o[:B, :hidden]

    out = {"prob": prob, "spike": spike, "pred": pred}
    new_state = {"prob": prob, "spike": spike}
    return out, new_state


if __name__ == "__main__":
    B, input_size, hidden = 8, 16, 32
    alpha = 0.7
    unimix = 0.01

    key = jax.random.PRNGKey(0)
    k1, k2, k3, k4, k5, k_bern = jax.random.split(key, 6)

    # Deterministic "randn" parameter init (same shapes as the nn.Module).
    w_ih = jax.random.normal(k1, (input_size, hidden), dtype=jnp.float32)
    w_hh = jax.random.normal(k2, (hidden, hidden), dtype=jnp.float32)

    x = jax.random.normal(k3, (B, input_size), dtype=jnp.float32)
    state = {
        "prob": jax.nn.sigmoid(jax.random.normal(k4, (B, hidden), dtype=jnp.float32)),
        "spike": (jax.random.uniform(k5, (B, hidden)) < 0.5).astype(jnp.float32),
    }

    out, new_state = leaky_rnn_cell_forward(
        x, state, w_ih, w_hh, alpha=alpha, unimix=unimix, key=k_bern)
    jax.block_until_ready(out)

    # Pure-JAX reference mirroring the kernel's bf16-operand / f32-accumulate
    # matmuls (the deterministic parts of the forward).
    input_term = jnp.dot(x.astype(jnp.bfloat16), w_ih.astype(jnp.bfloat16),
                         preferred_element_type=jnp.float32)
    hidden_term = jnp.dot(state["spike"].astype(jnp.bfloat16),
                          w_hh.astype(jnp.bfloat16),
                          preferred_element_type=jnp.float32)
    prob_ref = jax.nn.sigmoid(alpha * state["prob"]
                              + (1.0 - alpha) * (input_term + hidden_term))
    prob_ref = (1.0 - unimix) * prob_ref + unimix * 0.5
    pred_ref = jax.nn.sigmoid(jnp.dot(prob_ref.astype(jnp.bfloat16),
                                      w_hh.T.astype(jnp.bfloat16),
                                      preferred_element_type=jnp.float32))

    assert jnp.allclose(out["prob"], prob_ref, atol=3e-3, rtol=3e-3)
    assert jnp.allclose(out["pred"], pred_ref, atol=3e-3, rtol=3e-3)

    # Bernoulli draw: the kernel compared the same uniforms against its own
    # prob, so reconstruct the exact expected sample.
    u = jax.random.uniform(k_bern, (B, hidden), dtype=jnp.float32)
    spike_ref = (u < out["prob"]).astype(jnp.float32)
    assert jnp.array_equal(out["spike"], spike_ref)
    assert bool(jnp.all((out["spike"] == 0.0) | (out["spike"] == 1.0)))
    assert jnp.array_equal(new_state["prob"], out["prob"])
    assert jnp.array_equal(new_state["spike"], out["spike"])

    print("KERNEL_OK")
</pallas_src>

<mosaic_0001>
module attributes {stable_mosaic.version = 11 : i64} {
  func.func @_leaky_rnn_kernel(%arg0: i32, %arg1: memref<8x128xf32, #tpu.memory_space<vmem>>, %arg2: memref<8x128xf32, #tpu.memory_space<vmem>>, %arg3: memref<8x128xf32, #tpu.memory_space<vmem>>, %arg4: memref<8x128xf32, #tpu.memory_space<vmem>>, %arg5: memref<128x128xbf16, #tpu.memory_space<vmem>>, %arg6: memref<128x128xbf16, #tpu.memory_space<vmem>>, %arg7: memref<128x128xbf16, #tpu.memory_space<vmem>>, %arg8: memref<8x128xf32, #tpu.memory_space<vmem>>, %arg9: memref<8x128xf32, #tpu.memory_space<vmem>>, %arg10: memref<8x128xf32, #tpu.memory_space<vmem>>) attributes {dimension_semantics = [#tpu.dimension_semantics<parallel>], iteration_bounds = array<i64: 1>, scalar_prefetch = 0 : i64, scratch_operands = 0 : i64, tpu.core_type = #tpu.core_type<tc>, window_params = [{transform_indices = @transform_0, window_bounds = array<i64: 8, 128>}, {transform_indices = @transform_1, window_bounds = array<i64: 8, 128>}, {transform_indices = @transform_2, window_bounds = array<i64: 8, 128>}, {transform_indices = @transform_3, window_bounds = array<i64: 8, 128>}, {pipeline_mode = #tpu.pipeline_mode<synchronous>, transform_indices = @transform_4, window_bounds = array<i64: 128, 128>}, {pipeline_mode = #tpu.pipeline_mode<synchronous>, transform_indices = @transform_5, window_bounds = array<i64: 128, 128>}, {pipeline_mode = #tpu.pipeline_mode<synchronous>, transform_indices = @transform_6, window_bounds = array<i64: 128, 128>}, {transform_indices = @transform_7, window_bounds = array<i64: 8, 128>}, {transform_indices = @transform_8, window_bounds = array<i64: 8, 128>}, {transform_indices = @transform_9, window_bounds = array<i64: 8, 128>}]} {
    %c0 = arith.constant 0 : index
    %c0_0 = arith.constant 0 : index
    %0 = vector.load %arg1[%c0, %c0_0] : memref<8x128xf32, #tpu.memory_space<vmem>>, vector<8x128xf32>
    %c0_1 = arith.constant 0 : index
    %c0_2 = arith.constant 0 : index
    %1 = vector.load %arg2[%c0_1, %c0_2] : memref<8x128xf32, #tpu.memory_space<vmem>>, vector<8x128xf32>
    %c0_3 = arith.constant 0 : index
    %c0_4 = arith.constant 0 : index
    %2 = vector.load %arg3[%c0_3, %c0_4] : memref<8x128xf32, #tpu.memory_space<vmem>>, vector<8x128xf32>
    %3 = arith.truncf %0 : vector<8x128xf32> to vector<8x128xbf16>
    %c0_5 = arith.constant 0 : index
    %c0_6 = arith.constant 0 : index
    %4 = vector.load %arg5[%c0_5, %c0_6] : memref<128x128xbf16, #tpu.memory_space<vmem>>, vector<128x128xbf16>
    %cst = arith.constant dense<0.000000e+00> : vector<8x128xf32>
    %5 = tpu.matmul %3, %4, %cst {dimension_numbers = #tpu.dot_dimension_numbers<[1], [0], [0], [1], [0, 0, 1, 1], [], []>} : vector<8x128xbf16>, vector<128x128xbf16>, vector<8x128xf32> -> vector<8x128xf32>
    %6 = arith.truncf %1 : vector<8x128xf32> to vector<8x128xbf16>
    %c0_7 = arith.constant 0 : index
    %c0_8 = arith.constant 0 : index
    %7 = vector.load %arg6[%c0_7, %c0_8] : memref<128x128xbf16, #tpu.memory_space<vmem>>, vector<128x128xbf16>
    %cst_9 = arith.constant dense<0.000000e+00> : vector<8x128xf32>
    %8 = tpu.matmul %6, %7, %cst_9 {dimension_numbers = #tpu.dot_dimension_numbers<[1], [0], [0], [1], [0, 0, 1, 1], [], []>} : vector<8x128xbf16>, vector<128x128xbf16>, vector<8x128xf32> -> vector<8x128xf32>
    %cst_10 = arith.constant 0.699999988 : f32
    %9 = vector.broadcast %cst_10 : f32 to vector<8x128xf32>
    %10 = arith.mulf %9, %2 : vector<8x128xf32>
    %11 = arith.addf %5, %8 : vector<8x128xf32>
    %cst_11 = arith.constant 3.000000e-01 : f32
    %12 = vector.broadcast %cst_11 : f32 to vector<8x128xf32>
    %13 = arith.mulf %12, %11 : vector<8x128xf32>
    %14 = arith.addf %10, %13 : vector<8x128xf32>
    %15 = arith.negf %14 : vector<8x128xf32>
    %16 = math.exp %15 : vector<8x128xf32>
    %cst_12 = arith.constant 1.000000e+00 : f32
    %17 = vector.broadcast %cst_12 : f32 to vector<8x128xf32>
    %18 = arith.addf %17, %16 : vector<8x128xf32>
    %19 = arith.divf %17, %18 : vector<8x128xf32>
    %cst_13 = arith.constant 9.900000e-01 : f32
    %20 = vector.broadcast %cst_13 : f32 to vector<8x128xf32>
    %21 = arith.mulf %20, %19 : vector<8x128xf32>
    %cst_14 = arith.constant 5.000000e-03 : f32
    %22 = vector.broadcast %cst_14 : f32 to vector<8x128xf32>
    %23 = arith.addf %21, %22 : vector<8x128xf32>
    %24 = arith.truncf %23 : vector<8x128xf32> to vector<8x128xbf16>
    %c0_15 = arith.constant 0 : index
    %c0_16 = arith.constant 0 : index
    %25 = vector.load %arg7[%c0_15, %c0_16] : memref<128x128xbf16, #tpu.memory_space<vmem>>, vector<128x128xbf16>
    %cst_17 = arith.constant dense<0.000000e+00> : vector<8x128xf32>
    %26 = tpu.matmul %24, %25, %cst_17 {dimension_numbers = #tpu.dot_dimension_numbers<[1], [0], [0], [1], [0, 0, 1, 1], [], []>} : vector<8x128xbf16>, vector<128x128xbf16>, vector<8x128xf32> -> vector<8x128xf32>
    %27 = arith.negf %26 : vector<8x128xf32>
    %28 = math.exp %27 : vector<8x128xf32>
    %cst_18 = arith.constant 1.000000e+00 : f32
    %29 = vector.broadcast %cst_18 : f32 to vector<8x128xf32>
    %30 = arith.addf %29, %28 : vector<8x128xf32>
    %31 = arith.divf %29, %30 : vector<8x128xf32>
    %c0_19 = arith.constant 0 : index
    %c0_20 = arith.constant 0 : index
    %32 = vector.load %arg4[%c0_19, %c0_20] : memref<8x128xf32, #tpu.memory_space<vmem>>, vector<8x128xf32>
    %33 = arith.cmpf olt, %32, %23 : vector<8x128xf32>
    %34 = arith.extui %33 : vector<8x128xi1> to vector<8x128xi32>
    %35 = arith.sitofp %34 : vector<8x128xi32> to vector<8x128xf32>
    %c0_21 = arith.constant 0 : index
    %c0_22 = arith.constant 0 : index
    %36 = vector.load %arg8[%c0_21, %c0_22] : memref<8x128xf32, #tpu.memory_space<vmem>>, vector<8x128xf32>
    tpu.vector_store %arg8[%c0_21, %c0_22], %23 {strides = array<i32>} : memref<8x128xf32, #tpu.memory_space<vmem>>, vector<8x128xf32>,
    %c0_23 = arith.constant 0 : index
    %c0_24 = arith.constant 0 : index
    %37 = vector.load %arg9[%c0_23, %c0_24] : memref<8x128xf32, #tpu.memory_space<vmem>>, vector<8x128xf32>
    tpu.vector_store %arg9[%c0_23, %c0_24], %35 {strides = array<i32>} : memref<8x128xf32, #tpu.memory_space<vmem>>, vector<8x128xf32>,
    %c0_25 = arith.constant 0 : index
    %c0_26 = arith.constant 0 : index
    %38 = vector.load %arg10[%c0_25, %c0_26] : memref<8x128xf32, #tpu.memory_space<vmem>>, vector<8x128xf32>
    tpu.vector_store %arg10[%c0_25, %c0_26], %31 {strides = array<i32>} : memref<8x128xf32, #tpu.memory_space<vmem>>, vector<8x128xf32>,
    return
  }
  func.func @transform_0(%arg0: i32) -> (i32, i32) {
    %c0_i32 = arith.constant 0 : i32
    %c0_i32_0 = arith.constant 0 : i32
    return %arg0, %c0_i32 : i32, i32
  }
  func.func @transform_1(%arg0: i32) -> (i32, i32) {
    %c0_i32 = arith.constant 0 : i32
    %c0_i32_0 = arith.constant 0 : i32
    return %arg0, %c0_i32 : i32, i32
  }
  func.func @transform_2(%arg0: i32) -> (i32, i32) {
    %c0_i32 = arith.constant 0 : i32
    %c0_i32_0 = arith.constant 0 : i32
    return %arg0, %c0_i32 : i32, i32
  }
  func.func @transform_3(%arg0: i32) -> (i32, i32) {
    %c0_i32 = arith.constant 0 : i32
    %c0_i32_0 = arith.constant 0 : i32
    return %arg0, %c0_i32 : i32, i32
  }
  func.func @transform_4(%arg0: i32) -> (i32, i32) {
    %c0_i32 = arith.constant 0 : i32
    %c0_i32_0 = arith.constant 0 : i32
    %c0_i32_1 = arith.constant 0 : i32
    return %c0_i32, %c0_i32_0 : i32, i32
  }
  func.func @transform_5(%arg0: i32) -> (i32, i32) {
    %c0_i32 = arith.constant 0 : i32
    %c0_i32_0 = arith.constant 0 : i32
    %c0_i32_1 = arith.constant 0 : i32
    return %c0_i32, %c0_i32_0 : i32, i32
  }
  func.func @transform_6(%arg0: i32) -> (i32, i32) {
    %c0_i32 = arith.constant 0 : i32
    %c0_i32_0 = arith.constant 0 : i32
    %c0_i32_1 = arith.constant 0 : i32
    return %c0_i32, %c0_i32_0 : i32, i32
  }
  func.func @transform_7(%arg0: i32) -> (i32, i32) {
    %c0_i32 = arith.constant 0 : i32
    %c0_i32_0 = arith.constant 0 : i32
    return %arg0, %c0_i32 : i32, i32
  }
  func.func @transform_8(%arg0: i32) -> (i32, i32) {
    %c0_i32 = arith.constant 0 : i32
    %c0_i32_0 = arith.constant 0 : i32
    return %arg0, %c0_i32 : i32, i32
  }
  func.func @transform_9(%arg0: i32) -> (i32, i32) {
    %c0_i32 = arith.constant 0 : i32
    %c0_i32_0 = arith.constant 0 : i32
    return %arg0, %c0_i32 : i32, i32
  }
}

</mosaic_0001>

<bundles_post_ra>
// kernel: tpu_custom_call.1
= control target key start
LH: loop header
LB: loop body
LE: loop exit
PB: predicated region body
PF: predicated region fallthrough
CT: control target
= control target key end

     0   :  { %15 = vsyncpa [#allocation3], 0  ;;  %s1133_s0 = inlined_call_operand.hbm [shape: f32[8,128], index: 0, kind: input, shape index: {}]   ;;  %s1134_s1 = inlined_call_operand.hbm [shape: f32[8,128], index: 1, kind: input, shape index: {}]   ;;  %s1135_s2 = inlined_call_operand.hbm [shape: f32[8,128], index: 2, kind: input, shape index: {}]   ;;  %s1136_s3 = inlined_call_operand.hbm [shape: f32[8,128], index: 3, kind: input, shape index: {}]   ;;  %s1137_s4 = inlined_call_operand.hbm [shape: bf16[128,128], index: 4, kind: input, shape index: {}]   ;;  %s1138_s5 = inlined_call_operand.hbm [shape: bf16[128,128], index: 5, kind: input, shape index: {}]   ;;  %s1139_s6 = inlined_call_operand.hbm [shape: bf16[128,128], index: 6, kind: input, shape index: {}]   ;;  %s1140_s7 = inlined_call_operand.hbm [shape: f32[8,128], index: 7, kind: output, shape index: {0}]   ;;  %s1141_s8 = inlined_call_operand.hbm [shape: f32[8,128], index: 8, kind: output, shape index: {1}]   ;;  %s1142_s9 = inlined_call_operand.hbm [shape: f32[8,128], index: 9, kind: output, shape index: {2}]  }
   0x1   :  { %16 = vsyncpa [#allocation6], 0 }
   0x2   :  { %17 = vsyncpa [#allocation9], 0 }
   0x3   :  { %18 = vsyncpa [#allocation12], 0 }
   0x4   :  { %19 = vsyncpa [#allocation4], 0 }
   0x5   :  { %20 = vsyncpa [#allocation16], 0  ;;  %s902_s30 = smov [#allocation5]   ;;  %s903_s11 = smov [#allocation8]  }
   0x6   :  { %s37_s10 = sshll.u32 %s902_s30, 4  ;;  %s57_s12 = sshll.u32 %s903_s11, 4  ;;  %s38_s10 = int_to_ptr.vmem [resolvable:$true] %s37_s10  ;;  %s58_s12 = int_to_ptr.vmem [resolvable:$true] %s57_s12 }
   0x7   :  { %s670_s15 = scalar_lea.hbm %s1134_s1, 128 }
   0x8   :  { %p671_p0 = scmp.ne.s32.totalorder %s1134_s1, %s670_s15  ;;  %p674_p1 = scmp.lt.u32.totalorder %s670_s15, %s1134_s1 }
   0xa   :  { %p676_p2 = pnand %p674_p1, %p671_p0 }
   0xc   :  { %679 = shalt.err (!%p676_p2)
}
   0xd   :  { %s680_s20 = scalar_lea.vmem %s38_s10, 128  ;;  %p685_p4 = scmp.lt.s32.totalorder %s38_s10, %s38_s10 }
   0xe   :  { %p681_p3 = scmp.ne.s32.totalorder %s38_s10, %s680_s20  ;;  %p686_p5 = scmp.lt.s32.totalorder %s680_s20, %s680_s20 }
  0x10   :  { %p687_p6 = por %p686_p5, %p685_p4 }
  0x12   :  { %p688_p7 = pnand %p687_p6, %p681_p3 }
  0x14   :  { %691 = shalt.err (!%p688_p7)
}
  0x15   :  { %40 = dma.hbm_to_vmem [thread:$0]  %s1134_s1, 128, %s38_s10, [#allocation6]  }
  0x16   :  { %s692_s25 = scalar_lea.hbm %s1136_s3, 128 }
  0x17   :  { %p693_p8 = scmp.ne.s32.totalorder %s1136_s3, %s692_s25  ;;  %p696_p9 = scmp.lt.u32.totalorder %s692_s25, %s1136_s3 }
  0x19   :  { %p698_p10 = pnand %p696_p9, %p693_p8 }
  0x1b   :  { %701 = shalt.err (!%p698_p10)
}
  0x1c   :  { %s702_s30 = scalar_lea.vmem %s58_s12, 128  ;;  %p707_p12 = scmp.lt.s32.totalorder %s58_s12, %s58_s12 }
  0x1d   :  { %p703_p11 = scmp.ne.s32.totalorder %s58_s12, %s702_s30  ;;  %p708_p13 = scmp.lt.s32.totalorder %s702_s30, %s702_s30 }
  0x1f   :  { %p709_p0 = por %p708_p13, %p707_p12 }
  0x21   :  { %p710_p1 = pnand %p709_p0, %p703_p11 }
  0x23   :  { %713 = shalt.err (!%p710_p1)
}
  0x24   :  { %60 = dma.hbm_to_vmem [thread:$0]  %s1136_s3, 128, %s58_s12, [#allocation9]  }
  0x25   :  { %s904_s11 = smov [#allocation11]   ;;  %s905_s14 = smov [#allocation2]  }
  0x26   :  { %s78_s13 = sshll.u32 %s904_s11, 4  ;;  %s27_s15 = sshll.u32 %s905_s14, 4  ;;  %s79_s13 = int_to_ptr.vmem [resolvable:$true] %s78_s13  ;;  %s28_s15 = int_to_ptr.vmem [resolvable:$true] %s27_s15 }
  0x27   :  { %s714_s18 = scalar_lea.hbm %s1138_s5, 1024 }
  0x28   :  { %p715_p2 = scmp.ne.s32.totalorder %s1138_s5, %s714_s18  ;;  %p718_p3 = scmp.lt.u32.totalorder %s714_s18, %s1138_s5 }
  0x2a   :  { %p720_p4 = pnand %p718_p3, %p715_p2 }
  0x2c   :  { %723 = shalt.err (!%p720_p4)
}
  0x2d   :  { %s724_s3 = scalar_lea.vmem %s79_s13, 1024  ;;  %p729_p6 = scmp.lt.s32.totalorder %s79_s13, %s79_s13 }
  0x2e   :  { %p725_p5 = scmp.ne.s32.totalorder %s79_s13, %s724_s3  ;;  %p730_p7 = scmp.lt.s32.totalorder %s724_s3, %s724_s3 }
  0x30   :  { %p731_p8 = por %p730_p7, %p729_p6 }
  0x32   :  { %p732_p9 = pnand %p731_p8, %p725_p5 }
  0x34   :  { %735 = shalt.err (!%p732_p9)
}
  0x35   :  { %s906_s12 = smov 64   ;;  %s907_s23 = smov 4  }
  0x36   :  { %84 = dma.hbm_to_vmem [thread:$0]  %s1138_s5, 1024, %s79_s13, [#allocation12], %s906_s12, %s906_s12, %s907_s23  }
  0x37   :  { %s736_s28 = scalar_lea.hbm %s1133_s0, 128 }
  0x38   :  { %p737_p10 = scmp.ne.s32.totalorder %s1133_s0, %s736_s28  ;;  %p740_p11 = scmp.lt.u32.totalorder %s736_s28, %s1133_s0 }
  0x3a   :  { %p742_p12 = pnand %p740_p11, %p737_p10 }
  0x3c   :  { %745 = shalt.err (!%p742_p12)
}
  0x3d   :  { %s746_s11 = scalar_lea.vmem %s28_s15, 128  ;;  %p751_p0 = scmp.lt.s32.totalorder %s28_s15, %s28_s15 }
  0x3e   :  { %p747_p13 = scmp.ne.s32.totalorder %s28_s15, %s746_s11  ;;  %p752_p1 = scmp.lt.s32.totalorder %s746_s11, %s746_s11 }
  0x40   :  { %p753_p2 = por %p752_p1, %p751_p0 }
  0x42   :  { %p754_p3 = pnand %p753_p2, %p747_p13 }
  0x44   :  { %757 = shalt.err (!%p754_p3)
}
  0x45   :  { %30 = dma.hbm_to_vmem [thread:$0]  %s1133_s0, 128, %s28_s15, [#allocation3]  }
  0x46   :  { %s908_s14 = smov [#allocation7]   ;;  %s909_s17 = smov [#allocation10]  }
  0x47   :  { %s47_s16 = sshll.u32 %s908_s14, 4  ;;  %s66_s18 = sshll.u32 %s909_s17, 4  ;;  %s48_s16 = int_to_ptr.vmem [resolvable:$true] %s47_s16  ;;  %s1017_s18 = int_to_ptr.vmem [resolvable:$true] %s66_s18 }
  0x48   :  { %s758_s21 = scalar_lea.hbm %s1135_s2, 128 }
  0x49   :  { %p759_p4 = scmp.ne.s32.totalorder %s1135_s2, %s758_s21  ;;  %p762_p5 = scmp.lt.u32.totalorder %s758_s21, %s1135_s2 }
  0x4b   :  { %p764_p6 = pnand %p762_p5, %p759_p4 }
  0x4d   :  { %767 = shalt.err (!%p764_p6)
}
  0x4e   :  { %s768_s0 = scalar_lea.vmem %s48_s16, 128  ;;  %p773_p8 = scmp.lt.s32.totalorder %s48_s16, %s48_s16 }
  0x4f   :  { %p769_p7 = scmp.ne.s32.totalorder %s48_s16, %s768_s0  ;;  %p774_p9 = scmp.lt.s32.totalorder %s768_s0, %s768_s0 }
  0x51   :  { %p775_p10 = por %p774_p9, %p773_p8 }
  0x53   :  { %p776_p11 = pnand %p775_p10, %p769_p7 }
  0x55   :  { %779 = shalt.err (!%p776_p11)
}
  0x56   :  { %50 = dma.hbm_to_vmem [thread:$0]  %s1135_s2, 128, %s48_s16, [#allocation6]  }
  0x57   :  { %s780_s29 = scalar_lea.hbm %s1137_s4, 1024 }
  0x58   :  { %p781_p12 = scmp.ne.s32.totalorder %s1137_s4, %s780_s29  ;;  %p784_p13 = scmp.lt.u32.totalorder %s780_s29, %s1137_s4 }
  0x5a   :  { %p786_p0 = pnand %p784_p13, %p781_p12 }
  0x5c   :  { %789 = shalt.err (!%p786_p0)
}
  0x5d   :  { %s790_s5 = scalar_lea.vmem %s1017_s18, 1024  ;;  %p795_p2 = scmp.lt.s32.totalorder %s1017_s18, %s1017_s18 }
  0x5e   :  { %p791_p1 = scmp.ne.s32.totalorder %s1017_s18, %s790_s5  ;;  %p796_p3 = scmp.lt.s32.totalorder %s790_s5, %s790_s5 }
  0x60   :  { %p797_p4 = por %p796_p3, %p795_p2 }
  0x62   :  { %p798_p5 = pnand %p797_p4, %p791_p1 }
  0x64   :  { %801 = shalt.err (!%p798_p5)
}
  0x65   :  { %72 = dma.hbm_to_vmem [thread:$0]  %s1137_s4, 1024, %s1017_s18, [#allocation9], %s906_s12, %s906_s12, %s907_s23  }
  0x66   :  { %s910_s14 = smov [#allocation13]   ;;  %s802_s20 = scalar_lea.hbm %s1139_s6, 1024 }
  0x67   :  { %s90_s16 = sshll.u32 %s910_s14, 4  ;;  %p803_p6 = scmp.ne.s32.totalorder %s1139_s6, %s802_s20  ;;  %s91_s16 = int_to_ptr.vmem [resolvable:$true] %s90_s16 }
  0x68   :  { %p806_p7 = scmp.lt.u32.totalorder %s802_s20, %s1139_s6 }
  0x6a   :  { %p808_p8 = pnand %p806_p7, %p803_p6 }
  0x6c   :  { %811 = shalt.err (!%p808_p8)
}
  0x6d   :  { %s812_s25 = scalar_lea.vmem %s91_s16, 1024  ;;  %p817_p10 = scmp.lt.s32.totalorder %s91_s16, %s91_s16 }
  0x6e   :  { %p813_p9 = scmp.ne.s32.totalorder %s91_s16, %s812_s25  ;;  %p818_p11 = scmp.lt.s32.totalorder %s812_s25, %s812_s25 }
  0x70   :  { %p819_p12 = por %p818_p11, %p817_p10 }
  0x72   :  { %p820_p13 = pnand %p819_p12, %p813_p9 }
  0x74   :  { %823 = shalt.err (!%p820_p13)
}
  0x75   :  { %96 = dma.hbm_to_vmem [thread:$0]  %s1139_s6, 1024, %s91_s16, [#allocation12], %s906_s12, %s906_s12, %s907_s23  }
  0x76   :  { %890 = dma.done.wait [#allocation3], 128  }
  0x77   :  { %891 = vsyncadd [#allocation3], 4294967168 }
  0x78   :  { %892 = dma.done.wait [#allocation6], 256  }
  0x79   :  { %893 = vsyncadd [#allocation6], 4294967040 }
  0x7a   :  { %894 = dma.done.wait [#allocation9], 1152  }
  0x7b   :  { %895 = vsyncadd [#allocation9], 4294966144 }
  0x7c   :  { %896 = dma.done.wait [#allocation12], 2048  }
  0x7d   :  { %897 = vsyncadd [#allocation12], 4294965248  ;;  %v911_v0 = vmov 0.0   ;;  %vm912_vm0 = vmmov 0   ;;  %v638_v1 = vld [vmem:[#allocation11] sm:$0xff]   ;;  %v639_v2 = vld [vmem:[#allocation11 + $0x8] sm:$0xff]  }
  0x7e   :  { %560 = vmatprep.subr.bf16.mxu0 %v911_v0  ;;  %576 = vmatprep.mubr.msk.bf16.mxu0 %vm912_vm0, %v911_v0  ;;  %v640_v3 = vld [vmem:[#allocation11 + $0x10] sm:$0xff]   ;;  %v641_v4 = vld [vmem:[#allocation11 + $0x18] sm:$0xff]   ;;  %v642_v5 = vld [vmem:[#allocation11 + $0x20] sm:$0xff]   ;;  %s913_s6 = smov [#allocation15]   ;;  %s914_s23 = smov [#allocation14]  }
  0x7f   :  { %600 = vmatprep.subr.bf16.mxu1 %v911_v0  ;;  %616 = vmatprep.mubr.msk.bf16.mxu1 %vm912_vm0, %v911_v0  ;;  %v643_v6 = vld [vmem:[#allocation11 + $0x28] sm:$0xff]   ;;  %v644_v7 = vld [vmem:[#allocation11 + $0x30] sm:$0xff]   ;;  %v645_v8 = vld [vmem:[#allocation11 + $0x38] sm:$0xff]   ;;  %s477_s12 = sshll.u32 %s913_s6, 4  ;;  %s467_s0 = sshll.u32 %s914_s23, 4  ;;  %s478_s12 = int_to_ptr.vmem [resolvable:$true] %s477_s12  ;;  %s468_s0 = int_to_ptr.vmem [resolvable:$true] %s467_s0 }
  0x80   :  { %561 = vmatpush3.bf16.msra.mxu0 %v638_v1  ;;  %v120_v9 = vld [vmem:[#allocation5] sm:$0xff]  ;;  %v646_v11 = vld [vmem:[#allocation10] sm:$0xff]   ;;  %v648_v13 = vld [vmem:[#allocation10 + $0x10] sm:$0xff]   ;;  %s824_s15 = scalar_lea.vmem %s478_s12, 128  ;;  %p829_p1 = scmp.lt.s32.totalorder %s478_s12, %s478_s12 }
  0x81   :  { %562 = vmatprep.subr.bf16.mxu0 %v911_v0  ;;  %v139_v10 = vpack.c.bf16 %v120_v9, %v120_v9  ;;  %v647_v12 = vld [vmem:[#allocation10 + $0x8] sm:$0xff]   ;;  %v649_v14 = vld [vmem:[#allocation10 + $0x18] sm:$0xff]   ;;  %v650_v15 = vld [vmem:[#allocation10 + $0x20] sm:$0xff]   ;;  %p825_p0 = scmp.ne.s32.totalorder %s478_s12, %s824_s15  ;;  %p830_p2 = scmp.lt.s32.totalorder %s824_s15, %s824_s15 }
  0x82   :  { %v651_v16 = vld [vmem:[#allocation10 + $0x28] sm:$0xff]   ;;  %v652_v17 = vld [vmem:[#allocation10 + $0x30] sm:$0xff]   ;;  %v653_v18 = vld [vmem:[#allocation10 + $0x38] sm:$0xff]  }
  0x83   :  { %v119_v19 = vld [vmem:[#allocation2] sm:$0xff]  ;;  %v655_v22 = vld [vmem:[#allocation13 + $0x8] sm:$0xff]   ;;  %v656_v23 = vld [vmem:[#allocation13 + $0x10] sm:$0xff]   ;;  %p831_p3 = por %p830_p2, %p829_p1 }
  0x84   :  { %563 = vmatpush3.bf16.msra.mxu0 %v639_v2  ;;  %v122_v20 = vpack.c.bf16 %v119_v19, %v119_v19  ;;  %v654_v21 = vld [vmem:[#allocation13] sm:$0xff]   ;;  %v657_v24 = vld [vmem:[#allocation13 + $0x18] sm:$0xff]   ;;  %v659_v26 = vld [vmem:[#allocation13 + $0x28] sm:$0xff]  }
  0x85   :  { %564 = vmatprep.subr.bf16.mxu0 %v911_v0  ;;  %601 = vmatpush3.bf16.msra.mxu1 %v654_v21  ;;  %v658_v25 = vld [vmem:[#allocation13 + $0x20] sm:$0xff]   ;;  %v660_v27 = vld [vmem:[#allocation13 + $0x30] sm:$0xff]   ;;  %v661_v28 = vld [vmem:[#allocation13 + $0x38] sm:$0xff]   ;;  %p832_p4 = pnand %p831_p3, %p825_p0 }
  0x86   :  { %602 = vmatprep.subr.bf16.mxu1 %v911_v0  ;;  %v121_v29 = vld [vmem:[#allocation7] sm:$0xff]  ;;  %v454_v42 = vld [vmem:[#allocation8] sm:$0xff] }
  0x87   :  { %v244_v30 = vmul.f32 0.7, %v121_v29 }
  0x88   :  { %565 = vmatpush3.bf16.msra.mxu0 %v640_v3 }
  0x89   :  { %566 = vmatprep.subr.bf16.mxu0 %v911_v0  ;;  %603 = vmatpush3.bf16.msra.mxu1 %v655_v22 }
  0x8a   :  { %604 = vmatprep.subr.bf16.mxu1 %v911_v0 }
  0x8c   :  { %567 = vmatpush3.bf16.msra.mxu0 %v641_v4 }
  0x8d   :  { %568 = vmatprep.subr.bf16.mxu0 %v911_v0  ;;  %605 = vmatpush3.bf16.msra.mxu1 %v656_v23 }
  0x8e   :  { %606 = vmatprep.subr.bf16.mxu1 %v911_v0 }
  0x90   :  { %569 = vmatpush3.bf16.msra.mxu0 %v642_v5 }
  0x91   :  { %570 = vmatprep.subr.bf16.mxu0 %v911_v0  ;;  %607 = vmatpush3.bf16.msra.mxu1 %v657_v24 }
  0x92   :  { %608 = vmatprep.subr.bf16.mxu1 %v911_v0 }
  0x94   :  { %571 = vmatpush3.bf16.msra.mxu0 %v643_v6 }
  0x95   :  { %572 = vmatprep.subr.bf16.mxu0 %v911_v0  ;;  %609 = vmatpush3.bf16.msra.mxu1 %v658_v25 }
  0x96   :  { %610 = vmatprep.subr.bf16.mxu1 %v911_v0 }
  0x98   :  { %573 = vmatpush3.bf16.msra.mxu0 %v644_v7 }
  0x99   :  { %574 = vmatprep.subr.bf16.mxu0 %v911_v0  ;;  %611 = vmatpush3.bf16.msra.mxu1 %v659_v26 }
  0x9a   :  { %612 = vmatprep.subr.bf16.mxu1 %v911_v0 }
  0x9c   :  { %575 = vmatpush3.bf16.msra.mxu0 %v645_v8 }
  0x9d   :  { %580 = vmatprep.subr.bf16.mxu0 %v911_v0  ;;  %613 = vmatpush3.bf16.msra.mxu1 %v660_v27 }
  0x9e   :  { %614 = vmatprep.subr.bf16.mxu1 %v911_v0 }
  0x9f   :  { %577 = vmatmul.mubr.bf16.vlgmr.msra.gmra.mrb[0].mxu0 %v139_v10 }
  0xa0   :  { %581 = vmatpush3.bf16.msra.mxu0 %v646_v11  ;;  %596 = vmatprep.mubr.msk.bf16.mxu0 %vm912_vm0, %v911_v0 }
  0xa1   :  { %582 = vmatprep.subr.bf16.mxu0 %v911_v0  ;;  %615 = vmatpush3.bf16.msra.mxu1 %v661_v28 }
  0xa4   :  { %583 = vmatpush3.bf16.msra.mxu0 %v647_v12 }
  0xa5   :  { %584 = vmatprep.subr.bf16.mxu0 %v911_v0 }
  0xa8   :  { %585 = vmatpush3.bf16.msra.mxu0 %v648_v13 }
  0xa9   :  { %586 = vmatprep.subr.bf16.mxu0 %v911_v0 }
  0xac   :  { %587 = vmatpush3.bf16.msra.mxu0 %v649_v14 }
  0xad   :  { %588 = vmatprep.subr.bf16.mxu0 %v911_v0 }
  0xb0   :  { %589 = vmatpush3.bf16.msra.mxu0 %v650_v15 }
  0xb1   :  { %590 = vmatprep.subr.bf16.mxu0 %v911_v0 }
  0xb4   :  { %591 = vmatpush3.bf16.msra.mxu0 %v651_v16 }
  0xb5   :  { %592 = vmatprep.subr.bf16.mxu0 %v911_v0 }
  0xb8   :  { %593 = vmatpush3.bf16.msra.mxu0 %v652_v17 }
  0xb9   :  { %594 = vmatprep.subr.bf16.mxu0 %v911_v0 }
  0xbc   :  { %595 = vmatpush3.bf16.msra.mxu0 %v653_v18 }
  0xbf   :  { %597 = vmatmul.mubr.bf16.vlgmr.msra.gmra.mrb[0].mxu0 %v122_v20 }
 0x192   :  { %v327_v31 = vpop.f32.mrb[0].mxu0 }
 0x193   :  { %v333_v32 = vmul.f32 0.3, %v327_v31  ;;  %v598_v33 = vpop.f32.mrb[1].mxu0 }
 0x194   :  { %v330_v34 = vpop.f32.mrb[2].mxu0 }
 0x195   :  { %v334_v35 = vadd.f32 %v333_v32, %v244_v30  ;;  %v599_v36 = vpop.f32.mrb[3].mxu0 }
 0x197   :  { %v522_v37 = vmul.f32 -1.442695, %v334_v35 }
 0x199   :  { %662 = vpow2.f32 %v522_v37 }
 0x1a3   :  { %v663_v38 = vpop.eup %662 }
 0x1a4   :  { %v338_v39 = vadd.f32 1.0, %v663_v38 }
 0x1a6   :  { %664 = vrcp.f32 %v338_v39 }
 0x1b0   :  { %v665_v40 = vpop.eup %664 }
 0x1b1   :  { %v341_v41 = vmul.f32 0.99, %v665_v40 }
 0x1b3   :  { %v342_v43 = vadd.f32 0.005, %v341_v41 }
 0x1b5   :  { %v343_v44 = vpack.c.bf16 %v342_v43, %v342_v43  ;;  %458 = vst [vmem:[#allocation14] sm:$0xff] %v342_v43  ;;  %vm455_vm1 = vcmp.lt.f32.partialorder %v454_v42, %v342_v43 }
 0x1b6   :  { %v532_v45 = vsel %vm455_vm1, 1.0, %v911_v0 }
 0x1b7   :  { %617 = vmatmul.mubr.bf16.vlgmr.msra.gmra.mrb[0].mxu1 %v343_v44  ;;  %459 = vst [vmem:[#allocation15] sm:$0xff] %v532_v45 }
 0x1b8   :  { %835 = shalt.err (!%p832_p4)
}
 0x1b9   :  { %s836_s28 = scalar_lea.hbm %s1141_s8, 128 }
 0x1ba   :  { %p837_p5 = scmp.ne.s32.totalorder %s1141_s8, %s836_s28  ;;  %p840_p6 = scmp.lt.u32.totalorder %s836_s28, %s1141_s8 }
 0x1bc   :  { %p842_p7 = pnand %p840_p6, %p837_p5 }
 0x1be   :  { %845 = shalt.err (!%p842_p7)
}
 0x1bf   :  { %480 = dma.vmem_to_hbm [thread:$0]  %s478_s12, 128, %s1141_s8, [#allocation16]  }
 0x1c0   :  { %s846_s2 = scalar_lea.vmem %s468_s0, 128  ;;  %p851_p9 = scmp.lt.s32.totalorder %s468_s0, %s468_s0 }
 0x1c1   :  { %p847_p8 = scmp.ne.s32.totalorder %s468_s0, %s846_s2  ;;  %p852_p10 = scmp.lt.s32.totalorder %s846_s2, %s846_s2 }
 0x1c3   :  { %p853_p11 = por %p852_p10, %p851_p9 }
 0x1c5   :  { %p854_p12 = pnand %p853_p11, %p847_p8 }
 0x1c7   :  { %857 = shalt.err (!%p854_p12)
}
 0x1c8   :  { %s858_s16 = scalar_lea.hbm %s1140_s7, 128 }
 0x1c9   :  { %p859_p13 = scmp.ne.s32.totalorder %s1140_s7, %s858_s16  ;;  %p862_p0 = scmp.lt.u32.totalorder %s858_s16, %s1140_s7 }
 0x1cb   :  { %p864_p1 = pnand %p862_p0, %p859_p13 }
 0x1cd   :  { %867 = shalt.err (!%p864_p1)
}
 0x1ce   :  { %470 = dma.vmem_to_hbm [thread:$0]  %s468_s0, 128, %s1140_s7, [#allocation4]  }
 0x1cf   :  { %s915_s3 = smov [#allocation17]  }
 0x1d0   :  { %s487_s24 = sshll.u32 %s915_s3, 4  ;;  %s488_s24 = int_to_ptr.vmem [resolvable:$true] %s487_s24 }
 0x1d1   :  { %s868_s25 = scalar_lea.vmem %s488_s24, 128  ;;  %p873_p3 = scmp.lt.s32.totalorder %s488_s24, %s488_s24 }
 0x1d2   :  { %p869_p2 = scmp.ne.s32.totalorder %s488_s24, %s868_s25  ;;  %p874_p4 = scmp.lt.s32.totalorder %s868_s25, %s868_s25 }
 0x1d4   :  { %p875_p5 = por %p874_p4, %p873_p3 }
 0x1d6   :  { %p876_p6 = pnand %p875_p5, %p869_p2 }
 0x28a   :  { %v442_v46 = vpop.f32.mrb[0].mxu1 }
 0x28b   :  { %v531_v47 = vmul.f32 -1.442695, %v442_v46  ;;  %v618_v48 = vpop.f32.mrb[1].mxu1 }
 0x28c   :  { %v445_v49 = vpop.f32.mrb[2].mxu1 }
 0x28d   :  { %666 = vpow2.f32 %v531_v47  ;;  %v619_v50 = vpop.f32.mrb[3].mxu1 }
 0x297   :  { %v667_v51 = vpop.eup %666 }
 0x298   :  { %v451_v52 = vadd.f32 1.0, %v667_v51 }
 0x29a   :  { %668 = vrcp.f32 %v451_v52 }
 0x2a4   :  { %v669_v53 = vpop.eup %668 }
 0x2a5   :  { %460 = vst [vmem:[#allocation17] sm:$0xff] %v669_v53 }
 0x2a6   :  { %879 = shalt.err (!%p876_p6)
}
 0x2a7   :  { %s880_s18 = scalar_lea.hbm %s1142_s9, 128 }
 0x2a8   :  { %p881_p7 = scmp.ne.s32.totalorder %s1142_s9, %s880_s18  ;;  %p884_p8 = scmp.lt.u32.totalorder %s880_s18, %s1142_s9 }
 0x2aa   :  { %p886_p9 = pnand %p884_p8, %p881_p7 }
 0x2ac   :  { %889 = shalt.err (!%p886_p9)
}
 0x2ad   :  { %490 = dma.vmem_to_hbm [thread:$0]  %s488_s24, 128, %s1142_s9, [#allocation16]  }
 0x2ae   :  { %898 = dma.done.wait [#allocation4], 128  }
 0x2af   :  { %899 = vsyncadd [#allocation4], 4294967168 }
 0x2b0   :  { %900 = dma.done.wait [#allocation16], 256  }
 0x2b1   :  { %901 = vsyncadd [#allocation16], 4294967040 }
 0x2b2   :  { %500 = vsyncpa [#allocation3], 1 }
 0x2b3   :  { %501 = vsyncpa [#allocation6], 1 }
 0x2b4   :  { %502 = vsyncpa [#allocation9], 1 }
 0x2b5   :  { %503 = vsyncpa [#allocation12], 1 }
 0x2b6   :  { %504 = vsyncpa [#allocation4], 1 }
 0x2b7   :  { %505 = vsyncpa [#allocation16], 1 }

</bundles_post_ra>
